<compile_context>
chip_gen: v7x
topology: tpu7x:2x2x1
jax: 0.10.0
libtpu: 0.0.40
codegen_flags: <defaults>
</compile_context>

<pallas_src>
import jax
import jax.numpy as jnp
from jax.experimental import pallas as pl
from jax.experimental.pallas import tpu as pltpu

OBS_SHAPE = (7, 15)                          # obs_shape[0] * obs_shape[1] == 105
IN_FEATURES = OBS_SHAPE[0] * OBS_SHAPE[1]    # 105
IN_PAD = 128                                 # lane-aligned contraction dim
H1 = 128
H2 = 64
H2_PAD = 128                                 # lane-dense hidden tile
OUT = 1
OUT_PAD = 8                                  # narrow output slab (8 lanes)


def _round_up(n: int, m: int) -> int:
    return ((n + m - 1) // m) * m


def critic_mlp_kernel(x_ref, w1_ref, b1_ref, w2_ref, b2_ref, w3_ref, b3_ref,
                      o_ref):
    """Three fused Linear(+ReLU) layers for one batch tile, all in VMEM.

    x_ref : (TB, 128)   bf16, zero-padded input features (105 -> 128)
    w1_ref: (128, 128)  bf16, fc1 weight (in x out), zero rows for feature pad
    b1_ref: (1, 128)    f32
    w2_ref: (128, 128)  bf16, fc2 weight padded to 128 output cols (64 real)
    b2_ref: (1, 128)    f32, cols 0..63 real, rest zero
    w3_ref: (128, 8)    bf16, fc3 weight padded (in 64->128, out 1->8)
    b3_ref: (1, 8)      f32, col 0 real, rest zero
    o_ref : (TB, 8)     f32, column 0 is the critic value
    """
    x = x_ref[...]                                            # already bf16
    h1 = jnp.dot(x, w1_ref[...], preferred_element_type=jnp.float32) + b1_ref[...]
    h1 = jnp.maximum(h1, 0.0).astype(jnp.bfloat16)            # ReLU f32, cast for MXU
    h2 = jnp.dot(h1, w2_ref[...], preferred_element_type=jnp.float32) + b2_ref[...]
    h2 = jnp.maximum(h2, 0.0).astype(jnp.bfloat16)            # padded cols stay 0
    out = jnp.dot(h2, w3_ref[...], preferred_element_type=jnp.float32) + b3_ref[...]
    o_ref[...] = out                                          # (TB, 8) f32


def prepare_params(params):
    """One-time layout prep (hoisted out of the hot path).

    PyTorch Linear weight is (out, in); the kernel wants (in, out), bf16:
      fc1: input dim zero-padded 105 -> 128 (matches zero-padded x)
      fc2: output dim zero-padded 64 -> 128 (lane-dense hidden tile)
      fc3: input dim 64 -> 128, output dim 1 -> 8 (narrow lane slab)
    """
    w1, b1, w2, b2, w3, b3 = params
    w1_t = jnp.pad(w1.T, ((0, IN_PAD - IN_FEATURES), (0, 0))).astype(jnp.bfloat16)
    w2_t = jnp.pad(w2.T, ((0, 0), (0, H2_PAD - H2))).astype(jnp.bfloat16)
    w3_t = jnp.pad(w3.T, ((0, H2_PAD - H2), (0, OUT_PAD - OUT))).astype(jnp.bfloat16)
    b1_r = b1.reshape(1, H1).astype(jnp.float32)
    b2_r = jnp.pad(b2.reshape(1, H2), ((0, 0), (0, H2_PAD - H2))).astype(jnp.float32)
    b3_r = jnp.pad(b3.reshape(1, OUT), ((0, 0), (0, OUT_PAD - OUT))).astype(jnp.float32)
    return (w1_t, b1_r, w2_t, b2_r, w3_t, b3_r)


def _xla_forward(xb, prepared):
    """Plain XLA path for tiny batches; same bf16/f32 math as the kernel."""
    w1_t, b1_r, w2_t, b2_r, w3_t, b3_r = prepared
    xp = jnp.pad(xb, ((0, 0), (0, IN_PAD - IN_FEATURES))).astype(jnp.bfloat16)
    h = jnp.dot(xp, w1_t, preferred_element_type=jnp.float32) + b1_r
    h = jnp.maximum(h, 0.0).astype(jnp.bfloat16)
    h = jnp.dot(h, w2_t, preferred_element_type=jnp.float32) + b2_r
    h = jnp.maximum(h, 0.0).astype(jnp.bfloat16)
    out = jnp.dot(h, w3_t, preferred_element_type=jnp.float32) + b3_r
    return out[:, :OUT]


def _default_tb(batch: int) -> int:
    """Target ~2 balanced tiles (v7x: one per TensorCore), 256-aligned, <=2048."""
    per_core = pl.cdiv(batch, 2)
    return max(256, min(2048, _round_up(per_core, 256)))


def critic_forward(x, prepared, *, tb: int | None = None, min_pallas_batch: int = 64):
    """Run the critic on one obs (7,15) or a batch (B, 7, 15)/(B, 105).

    Returns (B, 1) f32 values ((1, 1) for a single observation), matching the
    PyTorch forward (modulo bf16 weight rounding).
    """
    w1_t, b1_r, w2_t, b2_r, w3_t, b3_r = prepared

    x = jnp.asarray(x, jnp.float32)
    if x.size == IN_FEATURES:
        xb = x.reshape(1, IN_FEATURES)
    else:
        xb = x.reshape(-1, IN_FEATURES)
    batch = xb.shape[0]

    # Tiny-batch / action-loop path: launch + weight DMA dominate -> plain XLA.
    if batch < min_pallas_batch and tb is None:
        return _xla_forward(xb, prepared)

    if tb is None:
        tb = _default_tb(batch)
    tb = _round_up(tb, 16)                 # bf16 (16,128) sublane packing
    b_pad = _round_up(batch, tb)
    n_tiles = b_pad // tb

    # Fused pad (105 -> 128 features, batch -> b_pad rows) + bf16 cast:
    # one wrapper pass, half the HBM bytes of the old f32 pad.
    x_pad = jnp.pad(xb, ((0, b_pad - batch),
                         (0, IN_PAD - IN_FEATURES))).astype(jnp.bfloat16)

    const = lambda i: (0, 0)   # weights: fetched once, VMEM-resident across grid
    out = pl.pallas_call(
        critic_mlp_kernel,
        out_shape=jax.ShapeDtypeStruct((b_pad, OUT_PAD), jnp.float32),
        grid=(n_tiles,),
        in_specs=[
            pl.BlockSpec((tb, IN_PAD), lambda i: (i, 0)),
            pl.BlockSpec((IN_PAD, H1), const),
            pl.BlockSpec((1, H1), const),
            pl.BlockSpec((H1, H2_PAD), const),
            pl.BlockSpec((1, H2_PAD), const),
            pl.BlockSpec((H2_PAD, OUT_PAD), const),
            pl.BlockSpec((1, OUT_PAD), const),
        ],
        out_specs=pl.BlockSpec((tb, OUT_PAD), lambda i: (i, 0)),
        compiler_params=pltpu.CompilerParams(
            dimension_semantics=("parallel",)),   # v7x: shard batch across 2 TCs
    )(x_pad, w1_t, b1_r, w2_t, b2_r, w3_t, b3_r)

    return out[:batch, :OUT]   # real rows, real column


def init_params(key):
    """Deterministic synthetic params matching nn.Linear shapes (out, in)."""
    k1, k2, k3, k4, k5, k6 = jax.random.split(key, 6)

    def uniform_fan_in(k, shape, fan_in):
        bound = 1.0 / jnp.sqrt(jnp.float32(fan_in))
        return jax.random.uniform(k, shape, jnp.float32, -bound, bound)

    w1 = uniform_fan_in(k1, (H1, IN_FEATURES), IN_FEATURES)  # (128, 105)
    b1 = uniform_fan_in(k2, (H1,), IN_FEATURES)
    w2 = uniform_fan_in(k3, (H2, H1), H1)                    # (64, 128)
    b2 = uniform_fan_in(k4, (H2,), H1)
    w3 = uniform_fan_in(k5, (OUT, H2), H2)                   # (1, 64)
    b3 = uniform_fan_in(k6, (OUT,), H2)
    return (w1, b1, w2, b2, w3, b3)


def critic_reference_f32(xb, params):
    """Pure-f32 JAX reference of the PyTorch forward."""
    w1, b1, w2, b2, w3, b3 = params
    h = jnp.maximum(xb @ w1.T + b1, 0.0)
    h = jnp.maximum(h @ w2.T + b2, 0.0)
    return h @ w3.T + b3


def critic_reference_bf16(xb, params):
    """Reference mirroring the kernel's bf16-weight / f32-accumulate math."""
    w1, b1, w2, b2, w3, b3 = params
    w1b, w2b, w3b = (w.astype(jnp.bfloat16) for w in (w1, w2, w3))
    h = jnp.dot(xb.astype(jnp.bfloat16), w1b.T,
                preferred_element_type=jnp.float32) + b1
    h = jnp.maximum(h, 0.0).astype(jnp.bfloat16)
    h = jnp.dot(h, w2b.T, preferred_element_type=jnp.float32) + b2
    h = jnp.maximum(h, 0.0).astype(jnp.bfloat16)
    return jnp.dot(h, w3b.T, preferred_element_type=jnp.float32) + b3


if __name__ == "__main__":
    key = jax.random.PRNGKey(0)
    k_param, k_x1, k_xb, k_xc = jax.random.split(key, 4)

    params = init_params(k_param)
    prepared = prepare_params(params)   # one-time layout prep, out of hot path

    # 1) Single observation — exact PyTorch semantics: x.view(1, 105).
    #    Goes through the tiny-batch XLA path (per-step weight DMA avoided).
    x1 = jax.random.normal(k_x1, OBS_SHAPE, dtype=jnp.float32)        # (7, 15)
    out1 = jax.block_until_ready(critic_forward(x1, prepared))
    ref1_bf16 = critic_reference_bf16(x1.reshape(1, IN_FEATURES), params)
    ref1_f32 = critic_reference_f32(x1.reshape(1, IN_FEATURES), params)
    assert out1.shape == (1, 1), out1.shape
    assert jnp.allclose(out1, ref1_bf16, atol=1e-2, rtol=1e-2), (out1, ref1_bf16)
    assert jnp.allclose(out1, ref1_f32, atol=1e-1, rtol=1e-1), (out1, ref1_f32)

    # 2) Batched Pallas path: default tiling -> tb=256, 2 parallel tiles.
    B = 512
    xb = jax.random.normal(k_xb, (B,) + OBS_SHAPE, dtype=jnp.float32)  # (512, 7, 15)
    outb = jax.block_until_ready(critic_forward(xb, prepared))
    refb_bf16 = critic_reference_bf16(xb.reshape(B, IN_FEATURES), params)
    assert outb.shape == (B, 1), outb.shape
    assert jnp.allclose(outb, refb_bf16, atol=1e-2, rtol=1e-2), (outb, refb_bf16)

    # 3) Ragged batch (exercises batch padding + multiple grid tiles).
    B2 = 300
    xc = jax.random.normal(k_xc, (B2, IN_FEATURES), dtype=jnp.float32)
    outc = jax.block_until_ready(critic_forward(xc, prepared, tb=128))
    refc_bf16 = critic_reference_bf16(xc, params)
    assert outc.shape == (B2, 1), outc.shape
    assert jnp.allclose(outc, refc_bf16, atol=1e-2, rtol=1e-2), (outc, refc_bf16)

    print("KERNEL_OK")
</pallas_src>

<mosaic_0001>
module attributes {stable_mosaic.version = 11 : i64} {
  func.func @critic_mlp_kernel(%arg0: i32, %arg1: memref<256x128xbf16, #tpu.memory_space<vmem>>, %arg2: memref<128x128xbf16, #tpu.memory_space<vmem>>, %arg3: memref<1x128xf32, #tpu.memory_space<vmem>>, %arg4: memref<128x128xbf16, #tpu.memory_space<vmem>>, %arg5: memref<1x128xf32, #tpu.memory_space<vmem>>, %arg6: memref<128x8xbf16, #tpu.memory_space<vmem>>, %arg7: memref<1x8xf32, #tpu.memory_space<vmem>>, %arg8: memref<256x8xf32, #tpu.memory_space<vmem>>) attributes {dimension_semantics = [#tpu.dimension_semantics<parallel>], iteration_bounds = array<i64: 2>, scalar_prefetch = 0 : i64, scratch_operands = 0 : i64, tpu.core_type = #tpu.core_type<tc>, window_params = [{transform_indices = @transform_0, window_bounds = array<i64: 256, 128>}, {pipeline_mode = #tpu.pipeline_mode<synchronous>, transform_indices = @transform_1, window_bounds = array<i64: 128, 128>}, {pipeline_mode = #tpu.pipeline_mode<synchronous>, transform_indices = @transform_2, window_bounds = array<i64: 1, 128>}, {pipeline_mode = #tpu.pipeline_mode<synchronous>, transform_indices = @transform_3, window_bounds = array<i64: 128, 128>}, {pipeline_mode = #tpu.pipeline_mode<synchronous>, transform_indices = @transform_4, window_bounds = array<i64: 1, 128>}, {pipeline_mode = #tpu.pipeline_mode<synchronous>, transform_indices = @transform_5, window_bounds = array<i64: 128, 8>}, {pipeline_mode = #tpu.pipeline_mode<synchronous>, transform_indices = @transform_6, window_bounds = array<i64: 1, 8>}, {transform_indices = @transform_7, window_bounds = array<i64: 256, 8>}]} {
    %c0 = arith.constant 0 : index
    %c0_0 = arith.constant 0 : index
    %0 = vector.load %arg1[%c0, %c0_0] : memref<256x128xbf16, #tpu.memory_space<vmem>>, vector<256x128xbf16>
    %c0_1 = arith.constant 0 : index
    %c0_2 = arith.constant 0 : index
    %1 = vector.load %arg2[%c0_1, %c0_2] : memref<128x128xbf16, #tpu.memory_space<vmem>>, vector<128x128xbf16>
    %cst = arith.constant dense<0.000000e+00> : vector<256x128xf32>
    %2 = tpu.matmul %0, %1, %cst {dimension_numbers = #tpu.dot_dimension_numbers<[1], [0], [0], [1], [0, 0, 1, 1], [], []>} : vector<256x128xbf16>, vector<128x128xbf16>, vector<256x128xf32> -> vector<256x128xf32>
    %c0_3 = arith.constant 0 : index
    %c0_4 = arith.constant 0 : index
    %3 = vector.load %arg3[%c0_3, %c0_4] : memref<1x128xf32, #tpu.memory_space<vmem>>, vector<1x128xf32>
    %4 = vector.broadcast %3 : vector<1x128xf32> to vector<256x128xf32>
    %5 = arith.addf %2, %4 : vector<256x128xf32>
    %cst_5 = arith.constant 0.000000e+00 : f32
    %6 = vector.broadcast %cst_5 : f32 to vector<256x128xf32>
    %7 = arith.maximumf %5, %6 : vector<256x128xf32>
    %8 = arith.truncf %7 : vector<256x128xf32> to vector<256x128xbf16>
    %c0_6 = arith.constant 0 : index
    %c0_7 = arith.constant 0 : index
    %9 = vector.load %arg4[%c0_6, %c0_7] : memref<128x128xbf16, #tpu.memory_space<vmem>>, vector<128x128xbf16>
    %cst_8 = arith.constant dense<0.000000e+00> : vector<256x128xf32>
    %10 = tpu.matmul %8, %9, %cst_8 {dimension_numbers = #tpu.dot_dimension_numbers<[1], [0], [0], [1], [0, 0, 1, 1], [], []>} : vector<256x128xbf16>, vector<128x128xbf16>, vector<256x128xf32> -> vector<256x128xf32>
    %c0_9 = arith.constant 0 : index
    %c0_10 = arith.constant 0 : index
    %11 = vector.load %arg5[%c0_9, %c0_10] : memref<1x128xf32, #tpu.memory_space<vmem>>, vector<1x128xf32>
    %12 = vector.broadcast %11 : vector<1x128xf32> to vector<256x128xf32>
    %13 = arith.addf %10, %12 : vector<256x128xf32>
    %cst_11 = arith.constant 0.000000e+00 : f32
    %14 = vector.broadcast %cst_11 : f32 to vector<256x128xf32>
    %15 = arith.maximumf %13, %14 : vector<256x128xf32>
    %16 = arith.truncf %15 : vector<256x128xf32> to vector<256x128xbf16>
    %c0_12 = arith.constant 0 : index
    %c0_13 = arith.constant 0 : index
    %17 = vector.load %arg6[%c0_12, %c0_13] : memref<128x8xbf16, #tpu.memory_space<vmem>>, vector<128x8xbf16>
    %cst_14 = arith.constant dense<0.000000e+00> : vector<256x8xf32>
    %18 = tpu.matmul %16, %17, %cst_14 {dimension_numbers = #tpu.dot_dimension_numbers<[1], [0], [0], [1], [0, 0, 1, 1], [], []>} : vector<256x128xbf16>, vector<128x8xbf16>, vector<256x8xf32> -> vector<256x8xf32>
    %c0_15 = arith.constant 0 : index
    %c0_16 = arith.constant 0 : index
    %19 = vector.load %arg7[%c0_15, %c0_16] : memref<1x8xf32, #tpu.memory_space<vmem>>, vector<1x8xf32>
    %20 = vector.broadcast %19 : vector<1x8xf32> to vector<256x8xf32>
    %21 = arith.addf %18, %20 : vector<256x8xf32>
    %c0_17 = arith.constant 0 : index
    %c0_18 = arith.constant 0 : index
    %22 = vector.load %arg8[%c0_17, %c0_18] : memref<256x8xf32, #tpu.memory_space<vmem>>, vector<256x8xf32>
    tpu.vector_store %arg8[%c0_17, %c0_18], %21 {strides = array<i32>} : memref<256x8xf32, #tpu.memory_space<vmem>>, vector<256x8xf32>,
    return
  }
  func.func @transform_0(%arg0: i32) -> (i32, i32) {
    %c0_i32 = arith.constant 0 : i32
    %c0_i32_0 = arith.constant 0 : i32
    return %arg0, %c0_i32 : i32, i32
  }
  func.func @transform_1(%arg0: i32) -> (i32, i32) {
    %c0_i32 = arith.constant 0 : i32
    %c0_i32_0 = arith.constant 0 : i32
    %c0_i32_1 = arith.constant 0 : i32
    return %c0_i32, %c0_i32_0 : i32, i32
  }
  func.func @transform_2(%arg0: i32) -> (i32, i32) {
    %c0_i32 = arith.constant 0 : i32
    %c0_i32_0 = arith.constant 0 : i32
    %c0_i32_1 = arith.constant 0 : i32
    return %c0_i32, %c0_i32_0 : i32, i32
  }
  func.func @transform_3(%arg0: i32) -> (i32, i32) {
    %c0_i32 = arith.constant 0 : i32
    %c0_i32_0 = arith.constant 0 : i32
    %c0_i32_1 = arith.constant 0 : i32
    return %c0_i32, %c0_i32_0 : i32, i32
  }
  func.func @transform_4(%arg0: i32) -> (i32, i32) {
    %c0_i32 = arith.constant 0 : i32
    %c0_i32_0 = arith.constant 0 : i32
    %c0_i32_1 = arith.constant 0 : i32
    return %c0_i32, %c0_i32_0 : i32, i32
  }
  func.func @transform_5(%arg0: i32) -> (i32, i32) {
    %c0_i32 = arith.constant 0 : i32
    %c0_i32_0 = arith.constant 0 : i32
    %c0_i32_1 = arith.constant 0 : i32
    return %c0_i32, %c0_i32_0 : i32, i32
  }
  func.func @transform_6(%arg0: i32) -> (i32, i32) {
    %c0_i32 = arith.constant 0 : i32
    %c0_i32_0 = arith.constant 0 : i32
    %c0_i32_1 = arith.constant 0 : i32
    return %c0_i32, %c0_i32_0 : i32, i32
  }
  func.func @transform_7(%arg0: i32) -> (i32, i32) {
    %c0_i32 = arith.constant 0 : i32
    %c0_i32_0 = arith.constant 0 : i32
    return %arg0, %c0_i32 : i32, i32
  }
}

</mosaic_0001>

<bundles_post_ra>
// kernel: tpu_custom_call.1
= control target key start
LH: loop header
LB: loop body
LE: loop exit
PB: predicated region body
PF: predicated region fallthrough
CT: control target
= control target key end

     0   :  { %12 = vsyncpa [#allocation3], 0  ;;  %s2278_s0 = inlined_call_operand.hbm [shape: bf16[512,128], index: 0, kind: input, shape index: {}]   ;;  %s2279_s1 = inlined_call_operand.vmem [shape: bf16[128,128], index: 1, kind: input, shape index: {}]   ;;  %s2280_s2 = inlined_call_operand.vmem [shape: f32[1,128], index: 2, kind: input, shape index: {}]   ;;  %s2281_s3 = inlined_call_operand.hbm [shape: bf16[128,128], index: 3, kind: input, shape index: {}]   ;;  %s2282_s4 = inlined_call_operand.vmem [shape: f32[1,128], index: 4, kind: input, shape index: {}]   ;;  %s2283_s5 = inlined_call_operand.vmem [shape: bf16[128,8], index: 5, kind: input, shape index: {}]   ;;  %s2284_s6 = inlined_call_operand.vmem [shape: f32[1,8], index: 6, kind: input, shape index: {}]   ;;  %s2285_s7 = inlined_call_operand.vmem [shape: f32[512,8], index: 7, kind: output, shape index: {}]  }
   0x1   :  { %14 = vsyncpa [#allocation3 + $0x1], 0 }
   0x2   :  { %15 = vsyncpa [#allocation5], 0  ;;  %s1872_s24 = smov 0   ;;  %s1874_s25 = smov 0  }
   0x3   :  { %s1876_s26 = smov 0   ;;  %s1878_s27 = smov 0  }
   0x4 LB: > { %s1347_s28 = sadd.s32 4294967295, %s1826_s27   ;;  %p41_p0 = scmp.ne.s32.totalorder %s1818_s25, %s1814_s24  ;;  %s1826_s27 = sphi %s1878_s27, %s2301_s27   ;;  %s1822_s26 = sphi %s1876_s26, %s2300_s26   ;;  %s1818_s25 = sphi %s1874_s25, %s2299_s25   ;;  %s1814_s24 = sphi %s1872_s24, %s2298_s24  }
   0x5   : > { %p1894_p1 = scmp.eq.s32.totalorder %s1347_s28, 0  ;;  %p1349_p2 = scmp.ge.s32.totalorder %s1826_s27, 1 }
   0x6   : > { %p204_p3 = scmp.lt.s32.totalorder %s1826_s27, 3  ;;  %s1828_s9 = smov [#allocation4]  }
   0x7   : > { %s2290_s29 = scalar_select %p1894_p1, 1, 0 }
   0x8   : > { %p1902_p4 = por %p1894_p1, %p41_p0  ;;  %p1906_p5 = pnand %p1349_p2, %p204_p3 }
   0x9   : > { %s222_s10 = sshll.u32 %s1828_s9, 4  ;;  %s1919_s12 = sadd.s32 1, %s1826_s27   ;;  %s223_s10 = int_to_ptr.vmem [resolvable:$true] %s222_s10 }
   0xa   : > { %s2291_s30 = scalar_select %p1902_p4, 1, 0 }
   0xb   : > { %s2292_s8 = scalar_select %p1906_p5, 1, 0 }
   0xc   : > { %p1644_p6 = pneg %p1906_p5  ;;  %s28_s13 = sadd.s32 1, %s1822_s26 }
   0xd   : > { %s25_s14 = ssub.s32 %s1826_s27, %s1919_s12  ;;  %s1730_s17 = scalar_lea.hbm %s2281_s3, 1024 }
   0xe   : > { %p1914_p7 = pnand %p1644_p6, %p1894_p1  ;;  %p1731_p8 = scmp.ne.s32.totalorder %s2281_s3, %s1730_s17 }
   0xf   : > { %p1737_p12 = scmp.lt.u32.totalorder %s1730_s17, %s2281_s3 }
  0x10   : > { %p1732_p9 = pneg %p1914_p7 }
  0x12   : > { %p1733_p10 = pnand %p1732_p9, %p1731_p8 }
  0x14   : > { %p1734_p11 = pneg %p1733_p10 }
  0x16   : > { %p1739_p13 = pnand %p1737_p12, %p1734_p11 }
  0x18   : > { %1742 = shalt.err (!%p1739_p13)
}
  0x19   : > { %s1743_s22 = scalar_lea.vmem %s223_s10, 1024  ;;  %p1751_p6 = scmp.lt.s32.totalorder %s223_s10, %s223_s10 }
  0x1a   : > { %p1744_p0 = scmp.ne.s32.totalorder %s223_s10, %s1743_s22  ;;  %p1752_p1 = scmp.lt.s32.totalorder %s1743_s22, %s1743_s22 }
  0x1c   : > { %p1746_p2 = pnand %p1744_p0, %p1732_p9  ;;  %p1753_p4 = por %p1752_p1, %p1751_p6 }
  0x1e   : > { %p1747_p3 = pneg %p1746_p2 }
  0x20   : > { %p1754_p5 = pnand %p1753_p4, %p1747_p3 }
  0x22   : > { %1757 = shalt.err (!%p1754_p5)
}
  0x23   : > { %s1829_s23 = smov 64   ;;  %s1830_s24 = smov 4  }
  0x24   : > { %1647 = dma.hbm_to_vmem [thread:$0]  (!%p1914_p7), %s2281_s3, 1024, %s223_s10, [#allocation5], %s1829_s23, %s1829_s23, %s1830_s24  }
  0x25   : > { %p26_p1 = scmp.eq.s32.totalorder %s25_s14, 0  ;;  %p35_p4 = scmp.ne.s32.totalorder %s1822_s26, %s1818_s25 }
  0x26   : > { %p36_p5 = scmp.eq.s32.totalorder %s1826_s27, 0  ;;  %p1653_p8 = scmp.lt.s32.totalorder %s1826_s27, 2 }
  0x27   : > { %s1948_s16 = scalar_select %p26_p1, %s1822_s26, %s28_s13  }
  0x28   : > { %p37_p9 = por %p36_p5, %p35_p4  ;;  %s245_s17 = sand.u32 1, %s1822_s26  }
  0x29   : > { %s1352_s18 = sshll.u32 %s245_s17, 7  ;;  %s1405_s19 = sshll.u32 %s1826_s27, 11 }
  0x2a   : > { %s1955_s11 = scalar_lea.hbm %s2278_s0, %s1405_s19  ;;  %s249_s10 = scalar_lea.vmem [#allocation2], %s1352_s18 }
  0x2b   : > { %s256_s14 = sshll.u32 %s249_s10, 4  ;;  %p1959_p7 = pnand %p1653_p8, %p37_p9  ;;  %s1957_s14 = int_to_ptr.vmem [resolvable:$true] %s256_s14 }
  0x2c   : > { %s1963_s22 = scalar_lea.sflag [#allocation3], %s245_s17  ;;  %s1758_s9 = scalar_lea.hbm %s1955_s11, 2048 }
  0x2d   : > { %p1759_p10 = scmp.ne.s32.totalorder %s1955_s11, %s1758_s9  ;;  %p1760_p11 = pneg %p1959_p7 }
  0x2e   : > { %s1763_s19 = scalar_lea.hbm %s2278_s0, 4096  ;;  %p1764_p0 = scmp.lt.u32.totalorder %s1955_s11, %s2278_s0 }
  0x2f   : > { %p1761_p12 = pnand %p1760_p11, %p1759_p10  ;;  %p1765_p2 = scmp.lt.u32.totalorder %s1763_s19, %s1758_s9 }
  0x30   : > { %p1767_p6 = scmp.lt.u32.totalorder %s1758_s9, %s1955_s11 }
  0x31   : > { %p1762_p13 = pneg %p1761_p12  ;;  %p1766_p3 = por %p1765_p2, %p1764_p0 }
  0x33   : > { %p1768_p1 = por %p1767_p6, %p1766_p3 }
  0x35   : > { %p1769_p4 = pnand %p1768_p1, %p1762_p13 }
  0x37   : > { %1772 = shalt.err (!%p1769_p4)
}
  0x38   : > { %s1773_s17 = scalar_lea.vmem %s1957_s14, 2048  ;;  %s1831_s10 = smov [#allocation2]  }
  0x39   : > { %p1774_p5 = scmp.ne.s32.totalorder %s1957_s14, %s1773_s17  ;;  %s1778_s15 = sshll.u32 %s1831_s10, 4  ;;  %s1779_s15 = int_to_ptr.vmem [resolvable:$false] %s1778_s15 }
  0x3a   : > { %s1780_s18 = scalar_lea.vmem %s1779_s15, 4096  ;;  %p1781_p10 = scmp.lt.s32.totalorder %s1957_s14, %s1779_s15 }
  0x3b   : > { %p1776_p8 = pnand %p1774_p5, %p1760_p11  ;;  %p1782_p12 = scmp.lt.s32.totalorder %s1780_s18, %s1773_s17 }
  0x3d   : > { %p1777_p9 = pneg %p1776_p8  ;;  %p1783_p0 = por %p1782_p12, %p1781_p10 }
  0x3f   : > { %p1784_p2 = pnand %p1783_p0, %p1777_p9 }
  0x41   : > { %1787 = shalt.err (!%p1784_p2)
}
  0x42   : > { %1651 = dma.hbm_to_vmem [thread:$0]  (!%p1959_p7), %s1955_s11, 2048, %s1957_s14, %s1963_s22, %s1829_s23, %s1829_s23, %s1830_s24  }
  0x43   : > { %p2295_p11 = scmp.ne.s32.totalorder %s2292_s8, 0 }
  0x44   : > { %s270_s9 = sand.u32 (!%p2295_p11), 1, %s1818_s25   ;;  %p2296_p13 = scmp.ne.s32.totalorder (!%p2295_p11), %s2291_s30, 0 }
  0x45   : > { %268 = sbr.rel (%p2295_p11) target bundleno = 831 (0x33f), region = 48  ;;  %s1356_s19 = sshll.u32 (!%p2295_p11), %s270_s9, 7 }
  0x46   : > { %s271_s20 = scalar_lea.sflag (!%p2295_p11), [#allocation3], %s270_s9  ;;  %s1997_s21 = scalar_lea.vmem (!%p2295_p11), [#allocation2], %s1356_s19 }
  0x4c   : > { %1805 = dma.done.wait (%p2296_p13), %s271_s20, 2048  }
  0x4d   : > { %1807 = vsyncadd (%p2296_p13), %s271_s20, 4294965248  ;;  %p2297_p3 = scmp.ne.s32.totalorder %s2290_s29, 0 }
  0x4f   : > { %1809 = dma.done.wait (%p2297_p3), [#allocation5], 1024  }
  0x50   : > { %1811 = vsyncadd (%p2297_p3), [#allocation5], 4294966272  ;;  %v1690_v0 = vld [vmem:[%s2279_s1] sm:$0xff]   ;;  %v1691_v1 = vld [vmem:[%s2279_s1 + $0x8] sm:$0xff]   ;;  %s1358_s11 = sshll.u32 %s1347_s28, 5  ;;  %vm1237_vm0 = vcmask 64512  }
  0x51   : > { %1478 = vmatprep.subr.bf16.mxu0 %v1690_v0  ;;  %1622 = vmatprep.subr.bf16.mxu1 %v1690_v0  ;;  %v1692_v2 = vld [vmem:[%s2279_s1 + $0x10] sm:$0xff]   ;;  %v1693_v3 = vld [vmem:[%s2279_s1 + $0x18] sm:$0xff]   ;;  %v1698_v4 = vld [vmem:[%s1997_s21] sm:$0xff]   ;;  %p311_p7 = scmp.lt.s32.totalorder %s1358_s11, 63 }
  0x52   : > { %1479 = vmatpush3.bf16.msra.mxu0 %v1690_v0  ;;  %1630 = vmatpush3.bf16.msra.mxu1 %v1690_v0  ;;  %v1694_v5 = vld [vmem:[%s2279_s1 + $0x20] sm:$0xff]   ;;  %v1695_v6 = vld [vmem:[%s2279_s1 + $0x28] sm:$0xff]   ;;  %v1696_v8 = vld [vmem:[%s2279_s1 + $0x30] sm:$0xff]  }
  0x53   : > { %1480 = vmatprep.subr.bf16.mxu0 %v1691_v1  ;;  %1623 = vmatprep.subr.bf16.mxu1 %v1691_v1  ;;  %v1706_v7 = vld [vmem:[%s1997_s21 + $0x40] sm:$0xff]   ;;  %v1697_v9 = vld [vmem:[%s2279_s1 + $0x38] sm:$0xff]   ;;  %v1699_v10 = vld [vmem:[%s1997_s21 + $0x8] sm:$0xff]   ;;  %s2303_s11 = smov (!%p311_p7, %s1358_s11), 63 }
  0x54   : > { %1494 = vmatprep.mubr.bf16.mxu0 %v1698_v4  ;;  %1510 = vmatprep.mubr.bf16.mxu1 %v1706_v7  ;;  %v1707_v11 = vld [vmem:[%s1997_s21 + $0x48] sm:$0xff]   ;;  %v1714_v12 = vld [vmem:[#allocation4] sm:$0xff]   ;;  %v1700_v13 = vld [vmem:[%s1997_s21 + $0x10] sm:$0xff]  }
  0x55   : > { %v1708_v14 = vld [vmem:[%s1997_s21 + $0x50] sm:$0xff]   ;;  %v1715_v15 = vld [vmem:[#allocation4 + $0x8] sm:$0xff]   ;;  %v1701_v17 = vld [vmem:[%s1997_s21 + $0x18] sm:$0xff]  }
  0x56   : > { %1481 = vmatpush3.bf16.msra.mxu0 %v1691_v1  ;;  %1631 = vmatpush3.bf16.msra.mxu1 %v1691_v1  ;;  %v1716_v16 = vld [vmem:[#allocation4 + $0x10] sm:$0xff]   ;;  %v1709_v18 = vld [vmem:[%s1997_s21 + $0x58] sm:$0xff]   ;;  %v1702_v19 = vld [vmem:[%s1997_s21 + $0x20] sm:$0xff]  }
  0x57   : > { %1482 = vmatprep.subr.bf16.mxu0 %v1692_v2  ;;  %1624 = vmatprep.subr.bf16.mxu1 %v1692_v2  ;;  %v1710_v20 = vld [vmem:[%s1997_s21 + $0x60] sm:$0xff]   ;;  %v1717_v21 = vld [vmem:[#allocation4 + $0x18] sm:$0xff]   ;;  %v1703_v23 = vld [vmem:[%s1997_s21 + $0x28] sm:$0xff]  }
  0x58   : > { %v1718_v22 = vld [vmem:[#allocation4 + $0x20] sm:$0xff]   ;;  %v1711_v24 = vld [vmem:[%s1997_s21 + $0x68] sm:$0xff]   ;;  %v1704_v25 = vld [vmem:[%s1997_s21 + $0x30] sm:$0xff]  }
  0x59   : > { %v1712_v26 = vld [vmem:[%s1997_s21 + $0x70] sm:$0xff]   ;;  %v1719_v27 = vld [vmem:[#allocation4 + $0x28] sm:$0xff]   ;;  %v1705_v28 = vld [vmem:[%s1997_s21 + $0x38] sm:$0xff]  }
  0x5a   : > { %1483 = vmatpush3.bf16.msra.mxu0 %v1692_v2  ;;  %1632 = vmatpush3.bf16.msra.mxu1 %v1692_v2  ;;  %v1713_v29 = vld [vmem:[%s1997_s21 + $0x78] sm:$0xff]   ;;  %v1720_v30 = vld [vmem:[#allocation4 + $0x30] sm:$0xff]   ;;  %v1722_v32 = vld [vmem:[%s2283_s5] sm:$0xff]   ;;  %s1359_s21 = sshll.u32 %s2303_s11, 3 }
  0x5b   : > { %1484 = vmatprep.subr.bf16.mxu0 %v1693_v3  ;;  %1625 = vmatprep.subr.bf16.mxu1 %v1693_v3  ;;  %v1721_v31 = vld [vmem:[#allocation4 + $0x38] sm:$0xff]   ;;  %v1723_v33 = vld [vmem:[%s2283_s5 + $0x8] sm:$0xff]   ;;  %v1724_v34 = vld [vmem:[%s2283_s5 + $0x10] sm:$0xff]   ;;  %s2167_s22 = scalar_lea.vmem %s2285_s7, %s1359_s21 }
  0x5c   : > { %v1725_v35 = vld [vmem:[%s2283_s5 + $0x18] sm:$0xff]   ;;  %v1726_v36 = vld [vmem:[%s2283_s5 + $0x20] sm:$0xff]   ;;  %v1727_v37 = vld [vmem:[%s2283_s5 + $0x28] sm:$0xff]  }
  0x5d   : > { %v2068_v38 = vld [vmem:[%s2280_s2] ss:$0 sm:$0xff] }
  0x5e   : > { %1485 = vmatpush3.bf16.msra.mxu0 %v1693_v3  ;;  %1633 = vmatpush3.bf16.msra.mxu1 %v1693_v3 }
  0x5f   : > { %1486 = vmatprep.subr.bf16.mxu0 %v1694_v5  ;;  %1626 = vmatprep.subr.bf16.mxu1 %v1694_v5 }
  0x62   : > { %1487 = vmatpush3.bf16.msra.mxu0 %v1694_v5  ;;  %1634 = vmatpush3.bf16.msra.mxu1 %v1694_v5 }
  0x63   : > { %1488 = vmatprep.subr.bf16.mxu0 %v1695_v6  ;;  %1627 = vmatprep.subr.bf16.mxu1 %v1695_v6 }
  0x66   : > { %1489 = vmatpush3.bf16.msra.mxu0 %v1695_v6  ;;  %1635 = vmatpush3.bf16.msra.mxu1 %v1695_v6 }
  0x67   : > { %1490 = vmatprep.subr.bf16.mxu0 %v1696_v8  ;;  %1628 = vmatprep.subr.bf16.mxu1 %v1696_v8 }
  0x6a   : > { %1491 = vmatpush3.bf16.msra.mxu0 %v1696_v8  ;;  %1636 = vmatpush3.bf16.msra.mxu1 %v1696_v8 }
  0x6b   : > { %1492 = vmatprep.subr.bf16.mxu0 %v1697_v9  ;;  %1629 = vmatprep.subr.bf16.mxu1 %v1697_v9 }
  0x6e   : > { %1493 = vmatpush3.bf16.msra.mxu0 %v1697_v9  ;;  %1637 = vmatpush3.bf16.msra.mxu1 %v1697_v9 }
  0x6f   : > { %1526 = vmatprep.subr.bf16.mxu1 %v1714_v12  ;;  %1574 = vmatprep.subr.bf16.mxu0 %v1722_v32 }
  0x71   : > { %1495 = vmatmul.mubr.bf16.vlgmr.msra.gmra.mrb[0].mxu0 %v1699_v10  ;;  %1511 = vmatmul.mubr.bf16.vlgmr.msra.gmra.mrb[0].mxu1 %v1707_v11 }
  0x72   : > { %1498 = vmatprep.mubr.bf16.mxu0 %v1700_v13  ;;  %1514 = vmatprep.mubr.bf16.mxu1 %v1708_v14 }
  0x73   : > { %1527 = vmatpush3.bf16.msra.mxu1 %v1714_v12  ;;  %1575 = vmatpush3.bf16.msra.mxu0 %v1722_v32 }
  0x74   : > { %1528 = vmatprep.subr.bf16.mxu1 %v1715_v15  ;;  %1576 = vmatprep.subr.bf16.mxu0 %v1723_v33 }
  0x77   : > { %1529 = vmatpush3.bf16.msra.mxu1 %v1715_v15  ;;  %1577 = vmatpush3.bf16.msra.mxu0 %v1723_v33 }
  0x78   : > { %1530 = vmatprep.subr.bf16.mxu1 %v1716_v16  ;;  %1578 = vmatprep.subr.bf16.mxu0 %v1724_v34 }
  0x79   : > { %1499 = vmatmul.mubr.bf16.gmra.mrb[4].mxu0 %v1701_v17  ;;  %1515 = vmatmul.mubr.bf16.gmra.mrb[4].mxu1 %v1709_v18 }
  0x7a   : > { %1502 = vmatprep.mubr.bf16.mxu0 %v1702_v19  ;;  %1518 = vmatprep.mubr.bf16.mxu1 %v1710_v20 }
  0x7b   : > { %1531 = vmatpush3.bf16.msra.mxu1 %v1716_v16  ;;  %1579 = vmatpush3.bf16.msra.mxu0 %v1724_v34 }
  0x7c   : > { %1532 = vmatprep.subr.bf16.mxu1 %v1717_v21  ;;  %1580 = vmatprep.subr.bf16.mxu0 %v1725_v35 }
  0x7f   : > { %1533 = vmatpush3.bf16.msra.mxu1 %v1717_v21  ;;  %1581 = vmatpush3.bf16.msra.mxu0 %v1725_v35 }
  0x80   : > { %1534 = vmatprep.subr.bf16.mxu1 %v1718_v22  ;;  %1582 = vmatprep.subr.bf16.mxu0 %v1726_v36 }
  0x81   : > { %1503 = vmatmul.mubr.bf16.gmra.mrb[8].mxu0 %v1703_v23  ;;  %1519 = vmatmul.mubr.bf16.gmra.mrb[8].mxu1 %v1711_v24 }
  0x82   : > { %1506 = vmatprep.mubr.bf16.mxu0 %v1704_v25  ;;  %1522 = vmatprep.mubr.bf16.mxu1 %v1712_v26 }
  0x83   : > { %1535 = vmatpush3.bf16.msra.mxu1 %v1718_v22  ;;  %1583 = vmatpush3.bf16.msra.mxu0 %v1726_v36 }
  0x84   : > { %1536 = vmatprep.subr.bf16.mxu1 %v1719_v27  ;;  %1584 = vmatprep.subr.bf16.mxu0 %v1727_v37 }
  0x87   : > { %1537 = vmatpush3.bf16.msra.mxu1 %v1719_v27  ;;  %1585 = vmatpush3.bf16.msra.mxu0 %v1727_v37 }
  0x88   : > { %1538 = vmatprep.subr.bf16.mxu1 %v1720_v30 }
  0x89   : > { %1507 = vmatmul.mubr.bf16.gmra.mrb[12].mxu0 %v1705_v28  ;;  %1523 = vmatmul.mubr.bf16.gmra.mrb[12].mxu1 %v1713_v29 }
  0x8b   : > { %1539 = vmatpush3.bf16.msra.mxu1 %v1720_v30 }
  0x8c   : > { %1540 = vmatprep.subr.bf16.mxu1 %v1721_v31 }
  0x8f   : > { %1541 = vmatpush3.bf16.msra.mxu1 %v1721_v31 }
 0x144   : > { %v1496_v39 = vpop.f32.mrb[0].mxu0  ;;  %v1512_v40 = vpop.f32.mrb[0].mxu1 }
 0x145   : > { %v559_v41 = vadd.f32 %v1496_v39, %v2068_v38  ;;  %v550_v42 = vpop.f32.mrb[1].mxu0  ;;  %v623_v43 = vadd.f32 %v1512_v40, %v2068_v38  ;;  %v614_v44 = vpop.f32.mrb[1].mxu1 }
 0x146   : > { %v551_v45 = vadd.f32 %v2068_v38, %v550_v42  ;;  %v1497_v46 = vpop.f32.mrb[2].mxu0  ;;  %v615_v47 = vadd.f32 %v2068_v38, %v614_v44  ;;  %v1513_v48 = vpop.f32.mrb[2].mxu1 }
 0x147   : > { %v562_v49 = vadd.f32 %v1497_v46, %v2068_v38  ;;  %v553_v50 = vpop.f32.mrb[3].mxu0  ;;  %v695_v51 = vmax.f32 %v623_v43, 0.0  ;;  %v626_v52 = vadd.f32 %v1513_v48, %v2068_v38  ;;  %v617_v53 = vpop.f32.mrb[3].mxu1  ;;  %v679_v57 = vmax.f32 %v559_v41, 0.0 }
 0x148   : > { %v554_v54 = vadd.f32 %v2068_v38, %v553_v50  ;;  %v693_v55 = vmax.f32 %v615_v47, 0.0  ;;  %v618_v56 = vadd.f32 %v2068_v38, %v617_v53  ;;  %v677_v60 = vmax.f32 %v551_v45, 0.0 }
 0x149   : > { %v680_v58 = vmax.f32 %v562_v49, 0.0  ;;  %v696_v59 = vmax.f32 %v626_v52, 0.0 }
 0x14a   : > { %v678_v61 = vmax.f32 %v554_v54, 0.0  ;;  %v694_v62 = vmax.f32 %v618_v56, 0.0 }
 0x14b   : > { %v710_v63 = vpack.c.bf16 %v680_v58, %v679_v57  ;;  %v2078_v0 = vpack.c.bf16 %v696_v59, %v695_v51 }
 0x14c   : > { %v709_v1 = vpack.c.bf16 %v678_v61, %v677_v60  ;;  %v1500_v2 = vpop.f32.mrb[4].mxu0  ;;  %v2080_v3 = vpack.c.bf16 %v694_v62, %v693_v55  ;;  %v1516_v4 = vpop.f32.mrb[4].mxu1 }
 0x14d   : > { %v575_v5 = vadd.f32 %v1500_v2, %v2068_v38  ;;  %v566_v6 = vpop.f32.mrb[5].mxu0  ;;  %v639_v7 = vadd.f32 %v1516_v4, %v2068_v38  ;;  %v630_v8 = vpop.f32.mrb[5].mxu1 }
 0x14e   : > { %v567_v9 = vadd.f32 %v2068_v38, %v566_v6  ;;  %v1501_v10 = vpop.f32.mrb[6].mxu0  ;;  %1542 = vmatprep.mubr.bf16.mxu1 %v709_v1  ;;  %v631_v11 = vadd.f32 %v2068_v38, %v630_v8  ;;  %v1517_v12 = vpop.f32.mrb[6].mxu1 }
 0x14f   : > { %v578_v13 = vadd.f32 %v1501_v10, %v2068_v38  ;;  %v569_v14 = vpop.f32.mrb[7].mxu0  ;;  %1543 = vmatmul.mubr.bf16.vlgmr.msra.gmra.mrb[16].mxu1 %v710_v63  ;;  %v699_v15 = vmax.f32 %v639_v7, 0.0  ;;  %v642_v16 = vadd.f32 %v1517_v12, %v2068_v38  ;;  %v633_v17 = vpop.f32.mrb[7].mxu1  ;;  %v683_v21 = vmax.f32 %v575_v5, 0.0 }
 0x150   : > { %v570_v18 = vadd.f32 %v2068_v38, %v569_v14  ;;  %v697_v19 = vmax.f32 %v631_v11, 0.0  ;;  %v634_v20 = vadd.f32 %v2068_v38, %v633_v17  ;;  %v681_v24 = vmax.f32 %v567_v9, 0.0 }
 0x151   : > { %v684_v22 = vmax.f32 %v578_v13, 0.0  ;;  %v700_v23 = vmax.f32 %v642_v16, 0.0 }
 0x152   : > { %v682_v25 = vmax.f32 %v570_v18, 0.0  ;;  %v698_v26 = vmax.f32 %v634_v20, 0.0 }
 0x153   : > { %v712_v27 = vpack.c.bf16 %v684_v22, %v683_v21  ;;  %v2090_v28 = vpack.c.bf16 %v700_v23, %v699_v15 }
 0x154   : > { %v711_v29 = vpack.c.bf16 %v682_v25, %v681_v24  ;;  %v1504_v30 = vpop.f32.mrb[8].mxu0  ;;  %v2092_v31 = vpack.c.bf16 %v698_v26, %v697_v19  ;;  %v1520_v32 = vpop.f32.mrb[8].mxu1 }
 0x155   : > { %v591_v33 = vadd.f32 %v1504_v30, %v2068_v38  ;;  %v582_v34 = vpop.f32.mrb[9].mxu0  ;;  %v655_v35 = vadd.f32 %v1520_v32, %v2068_v38  ;;  %v646_v36 = vpop.f32.mrb[9].mxu1 }
 0x156   : > { %v583_v37 = vadd.f32 %v2068_v38, %v582_v34  ;;  %v1505_v39 = vpop.f32.mrb[10].mxu0  ;;  %1546 = vmatprep.mubr.bf16.mxu1 %v711_v29  ;;  %v647_v40 = vadd.f32 %v2068_v38, %v646_v36  ;;  %v1521_v41 = vpop.f32.mrb[10].mxu1 }
 0x157   : > { %v594_v42 = vadd.f32 %v1505_v39, %v2068_v38  ;;  %v585_v43 = vpop.f32.mrb[11].mxu0  ;;  %1547 = vmatmul.mubr.bf16.gmra.mrb[20].mxu1 %v712_v27  ;;  %v703_v44 = vmax.f32 %v655_v35, 0.0  ;;  %v658_v45 = vadd.f32 %v1521_v41, %v2068_v38  ;;  %v649_v46 = vpop.f32.mrb[11].mxu1  ;;  %v687_v50 = vmax.f32 %v591_v33, 0.0 }
 0x158   : > { %v586_v47 = vadd.f32 %v2068_v38, %v585_v43  ;;  %v701_v48 = vmax.f32 %v647_v40, 0.0  ;;  %v650_v49 = vadd.f32 %v2068_v38, %v649_v46  ;;  %v685_v53 = vmax.f32 %v583_v37, 0.0 }
 0x159   : > { %v688_v51 = vmax.f32 %v594_v42, 0.0  ;;  %v704_v52 = vmax.f32 %v658_v45, 0.0 }
 0x15a   : > { %v686_v54 = vmax.f32 %v586_v47, 0.0  ;;  %v702_v55 = vmax.f32 %v650_v49, 0.0 }
 0x15b   : > { %v714_v56 = vpack.c.bf16 %v688_v51, %v687_v50  ;;  %v722_v57 = vpack.c.bf16 %v704_v52, %v703_v44 }
 0x15c   : > { %v713_v58 = vpack.c.bf16 %v686_v54, %v685_v53  ;;  %v1508_v59 = vpop.f32.mrb[12].mxu0  ;;  %v721_v60 = vpack.c.bf16 %v702_v55, %v701_v48  ;;  %v1524_v61 = vpop.f32.mrb[12].mxu1 }
 0x15d   : > { %v607_v62 = vadd.f32 %v1508_v59, %v2068_v38  ;;  %v598_v63 = vpop.f32.mrb[13].mxu0  ;;  %v671_v1 = vadd.f32 %v1524_v61, %v2068_v38  ;;  %v662_v2 = vpop.f32.mrb[13].mxu1 }
 0x15e   : > { %v599_v4 = vadd.f32 %v2068_v38, %v598_v63  ;;  %v1509_v5 = vpop.f32.mrb[14].mxu0  ;;  %1550 = vmatprep.mubr.bf16.mxu1 %v713_v58  ;;  %v663_v6 = vadd.f32 %v2068_v38, %v662_v2  ;;  %v1525_v7 = vpop.f32.mrb[14].mxu1 }
 0x15f   : > { %v610_v8 = vadd.f32 %v1509_v5, %v2068_v38  ;;  %v601_v9 = vpop.f32.mrb[15].mxu0  ;;  %1551 = vmatmul.mubr.bf16.gmra.mrb[24].mxu1 %v714_v56  ;;  %v707_v10 = vmax.f32 %v671_v1, 0.0  ;;  %v674_v11 = vadd.f32 %v1525_v7, %v2068_v38  ;;  %v665_v12 = vpop.f32.mrb[15].mxu1  ;;  %v691_v16 = vmax.f32 %v607_v62, 0.0 }
 0x160   : > { %v602_v13 = vadd.f32 %v2068_v38, %v601_v9  ;;  %v705_v14 = vmax.f32 %v663_v6, 0.0  ;;  %v666_v15 = vadd.f32 %v2068_v38, %v665_v12  ;;  %v689_v19 = vmax.f32 %v599_v4, 0.0  ;;  %v1728_v38 = vld [vmem:[%s2283_s5 + $0x30] sm:$0xff]  }
 0x161   : > { %v692_v17 = vmax.f32 %v610_v8, 0.0  ;;  %v708_v18 = vmax.f32 %v674_v11, 0.0  ;;  %1586 = vmatprep.subr.bf16.mxu0 %v1728_v38 }
 0x162   : > { %v690_v20 = vmax.f32 %v602_v13, 0.0  ;;  %v706_v21 = vmax.f32 %v666_v15, 0.0  ;;  %1587 = vmatpush3.bf16.msra.mxu0 %v1728_v38 }
 0x163   : > { %v716_v22 = vpack.c.bf16 %v692_v17, %v691_v16  ;;  %v724_v23 = vpack.c.bf16 %v708_v18, %v707_v10 }
 0x164   : > { %v715_v24 = vpack.c.bf16 %v690_v20, %v689_v19  ;;  %v723_v25 = vpack.c.bf16 %v706_v21, %v705_v14 }
 0x166   : > { %1554 = vmatprep.mubr.bf16.mxu1 %v715_v24 }
 0x167   : > { %1555 = vmatmul.mubr.bf16.gmra.mrb[28].mxu1 %v716_v22 }
 0x168   : > { %1558 = vmatprep.mubr.bf16.mxu1 %v2080_v3  ;;  %v1729_v3 = vld [vmem:[%s2283_s5 + $0x38] sm:$0xff]  }
 0x169   : > { %1588 = vmatprep.subr.bf16.mxu0 %v1729_v3 }
 0x16a   : > { %1589 = vmatpush3.bf16.msra.mxu0 %v1729_v3 }
 0x16f   : > { %1559 = vmatmul.mubr.bf16.gmra.mrb[32].mxu1 %v2078_v0  ;;  %v2123_v0 = vld [vmem:[%s2282_s4] ss:$0 sm:$0xff] }
 0x170   : > { %1562 = vmatprep.mubr.bf16.mxu1 %v2092_v31 }
 0x177   : > { %1563 = vmatmul.mubr.bf16.gmra.mrb[36].mxu1 %v2090_v28 }
 0x178   : > { %1566 = vmatprep.mubr.bf16.mxu1 %v721_v60 }
 0x17f   : > { %1567 = vmatmul.mubr.bf16.gmra.mrb[40].mxu1 %v722_v57 }
 0x180   : > { %1570 = vmatprep.mubr.bf16.mxu1 %v723_v25 }
 0x187   : > { %1571 = vmatmul.mubr.bf16.gmra.mrb[44].mxu1 %v724_v23 }
 0x222   : > { %v1544_v26 = vpop.f32.mrb[16].mxu1 }
 0x223   : > { %v839_v27 = vadd.f32 %v1544_v26, %v2123_v0  ;;  %v830_v28 = vpop.f32.mrb[17].mxu1 }
 0x224   : > { %v831_v29 = vadd.f32 %v2123_v0, %v830_v28  ;;  %v1545_v30 = vpop.f32.mrb[18].mxu1 }
 0x225   : > { %v842_v31 = vadd.f32 %v1545_v30, %v2123_v0  ;;  %v833_v32 = vpop.f32.mrb[19].mxu1  ;;  %v959_v34 = vmax.f32 %v839_v27, 0.0 }
 0x226   : > { %v834_v33 = vadd.f32 %v2123_v0, %v833_v32  ;;  %v957_v36 = vmax.f32 %v831_v29, 0.0 }
 0x227   : > { %v960_v35 = vmax.f32 %v842_v31, 0.0 }
 0x228   : > { %v958_v37 = vmax.f32 %v834_v33, 0.0 }
 0x229   : > { %v990_v39 = vpack.c.bf16 %v960_v35, %v959_v34 }
 0x22a   : > { %v989_v40 = vpack.c.bf16 %v958_v37, %v957_v36  ;;  %v1548_v41 = vpop.f32.mrb[20].mxu1 }
 0x22b   : > { %v855_v42 = vadd.f32 %v1548_v41, %v2123_v0  ;;  %v846_v43 = vpop.f32.mrb[21].mxu1 }
 0x22c   : > { %v847_v44 = vadd.f32 %v2123_v0, %v846_v43  ;;  %v1549_v45 = vpop.f32.mrb[22].mxu1  ;;  %1590 = vmatprep.mubr.bf16.mxu0 %v989_v40 }
 0x22d   : > { %v858_v46 = vadd.f32 %v1549_v45, %v2123_v0  ;;  %v849_v47 = vpop.f32.mrb[23].mxu1  ;;  %1591 = vmatmul.mubr.bf16.vlgmr.msra.gmra.mrb[16].mxu0 %v990_v39  ;;  %v963_v49 = vmax.f32 %v855_v42, 0.0 }
 0x22e   : > { %v850_v48 = vadd.f32 %v2123_v0, %v849_v47  ;;  %v961_v51 = vmax.f32 %v847_v44, 0.0 }
 0x22f   : > { %v964_v50 = vmax.f32 %v858_v46, 0.0 }
 0x230   : > { %v962_v52 = vmax.f32 %v850_v48, 0.0 }
 0x231   : > { %v992_v53 = vpack.c.bf16 %v964_v50, %v963_v49 }
 0x232   : > { %v991_v54 = vpack.c.bf16 %v962_v52, %v961_v51  ;;  %v1552_v55 = vpop.f32.mrb[24].mxu1 }
 0x233   : > { %v871_v56 = vadd.f32 %v1552_v55, %v2123_v0  ;;  %v862_v57 = vpop.f32.mrb[25].mxu1 }
 0x234   : > { %v863_v58 = vadd.f32 %v2123_v0, %v862_v57  ;;  %v1553_v59 = vpop.f32.mrb[26].mxu1  ;;  %1594 = vmatprep.mubr.bf16.mxu0 %v991_v54 }
 0x235   : > { %v874_v60 = vadd.f32 %v1553_v59, %v2123_v0  ;;  %v865_v61 = vpop.f32.mrb[27].mxu1  ;;  %1595 = vmatmul.mubr.bf16.gmra.mrb[20].mxu0 %v992_v53  ;;  %v967_v63 = vmax.f32 %v871_v56, 0.0 }
 0x236   : > { %v866_v62 = vadd.f32 %v2123_v0, %v865_v61  ;;  %v965_v2 = vmax.f32 %v863_v58, 0.0 }
 0x237   : > { %v968_v1 = vmax.f32 %v874_v60, 0.0 }
 0x238   : > { %v966_v4 = vmax.f32 %v866_v62, 0.0 }
 0x239   : > { %v994_v5 = vpack.c.bf16 %v968_v1, %v967_v63 }
 0x23a   : > { %v993_v6 = vpack.c.bf16 %v966_v4, %v965_v2  ;;  %v1556_v7 = vpop.f32.mrb[28].mxu1 }
 0x23b   : > { %v887_v8 = vadd.f32 %v1556_v7, %v2123_v0  ;;  %v878_v9 = vpop.f32.mrb[29].mxu1 }
 0x23c   : > { %v879_v10 = vadd.f32 %v2123_v0, %v878_v9  ;;  %v1557_v11 = vpop.f32.mrb[30].mxu1  ;;  %1598 = vmatprep.mubr.bf16.mxu0 %v993_v6 }
 0x23d   : > { %v890_v12 = vadd.f32 %v1557_v11, %v2123_v0  ;;  %v881_v13 = vpop.f32.mrb[31].mxu1  ;;  %1599 = vmatmul.mubr.bf16.gmra.mrb[24].mxu0 %v994_v5  ;;  %v971_v15 = vmax.f32 %v887_v8, 0.0 }
 0x23e   : > { %v882_v14 = vadd.f32 %v2123_v0, %v881_v13  ;;  %v969_v17 = vmax.f32 %v879_v10, 0.0 }
 0x23f   : > { %v972_v16 = vmax.f32 %v890_v12, 0.0 }
 0x240   : > { %v970_v18 = vmax.f32 %v882_v14, 0.0  ;;  %v2162_v14 = vld [vmem:[%s2284_s6] ss:$0 sm:$0xff] }
 0x241   : > { %v996_v19 = vpack.c.bf16 %v972_v16, %v971_v15 }
 0x242   : > { %v995_v20 = vpack.c.bf16 %v970_v18, %v969_v17  ;;  %v1560_v21 = vpop.f32.mrb[32].mxu1 }
 0x243   : > { %v903_v22 = vadd.f32 %v1560_v21, %v2123_v0  ;;  %v894_v23 = vpop.f32.mrb[33].mxu1 }
 0x244   : > { %v895_v24 = vadd.f32 %v2123_v0, %v894_v23  ;;  %v1561_v25 = vpop.f32.mrb[34].mxu1  ;;  %1602 = vmatprep.mubr.bf16.mxu0 %v995_v20 }
 0x245   : > { %v906_v38 = vadd.f32 %v1561_v25, %v2123_v0  ;;  %v897_v3 = vpop.f32.mrb[35].mxu1  ;;  %1603 = vmatmul.mubr.bf16.gmra.mrb[28].mxu0 %v996_v19  ;;  %v975_v27 = vmax.f32 %v903_v22, 0.0 }
 0x246   : > { %v898_v26 = vadd.f32 %v2123_v0, %v897_v3  ;;  %v973_v29 = vmax.f32 %v895_v24, 0.0 }
 0x247   : > { %v976_v28 = vmax.f32 %v906_v38, 0.0 }
 0x248   : > { %v974_v30 = vmax.f32 %v898_v26, 0.0 }
 0x249   : > { %v998_v31 = vpack.c.bf16 %v976_v28, %v975_v27 }
 0x24a   : > { %v997_v32 = vpack.c.bf16 %v974_v30, %v973_v29  ;;  %v1564_v33 = vpop.f32.mrb[36].mxu1 }
 0x24b   : > { %v919_v34 = vadd.f32 %v1564_v33, %v2123_v0  ;;  %v910_v35 = vpop.f32.mrb[37].mxu1 }
 0x24c   : > { %v911_v36 = vadd.f32 %v2123_v0, %v910_v35  ;;  %v1565_v37 = vpop.f32.mrb[38].mxu1  ;;  %1606 = vmatprep.mubr.bf16.mxu0 %v997_v32 }
 0x24d   : > { %v922_v39 = vadd.f32 %v1565_v37, %v2123_v0  ;;  %v913_v40 = vpop.f32.mrb[39].mxu1  ;;  %1607 = vmatmul.mubr.bf16.gmra.mrb[32].mxu0 %v998_v31  ;;  %v979_v42 = vmax.f32 %v919_v34, 0.0 }
 0x24e   : > { %v914_v41 = vadd.f32 %v2123_v0, %v913_v40  ;;  %v977_v44 = vmax.f32 %v911_v36, 0.0 }
 0x24f   : > { %v980_v43 = vmax.f32 %v922_v39, 0.0 }
 0x250   : > { %v978_v45 = vmax.f32 %v914_v41, 0.0 }
 0x251   : > { %v1000_v46 = vpack.c.bf16 %v980_v43, %v979_v42 }
 0x252   : > { %v999_v47 = vpack.c.bf16 %v978_v45, %v977_v44  ;;  %v1568_v48 = vpop.f32.mrb[40].mxu1 }
 0x253   : > { %v935_v49 = vadd.f32 %v1568_v48, %v2123_v0  ;;  %v926_v50 = vpop.f32.mrb[41].mxu1 }
 0x254   : > { %v927_v51 = vadd.f32 %v2123_v0, %v926_v50  ;;  %v1569_v52 = vpop.f32.mrb[42].mxu1  ;;  %1610 = vmatprep.mubr.bf16.mxu0 %v999_v47 }
 0x255   : > { %v938_v53 = vadd.f32 %v1569_v52, %v2123_v0  ;;  %v929_v54 = vpop.f32.mrb[43].mxu1  ;;  %1611 = vmatmul.mubr.bf16.gmra.mrb[36].mxu0 %v1000_v46  ;;  %v983_v56 = vmax.f32 %v935_v49, 0.0 }
 0x256   : > { %v930_v55 = vadd.f32 %v2123_v0, %v929_v54  ;;  %v981_v58 = vmax.f32 %v927_v51, 0.0 }
 0x257   : > { %v984_v57 = vmax.f32 %v938_v53, 0.0 }
 0x258   : > { %v982_v59 = vmax.f32 %v930_v55, 0.0 }
 0x259   : > { %v1002_v60 = vpack.c.bf16 %v984_v57, %v983_v56 }
 0x25a   : > { %v1001_v61 = vpack.c.bf16 %v982_v59, %v981_v58  ;;  %v1572_v62 = vpop.f32.mrb[44].mxu1 }
 0x25b   : > { %v951_v63 = vadd.f32 %v1572_v62, %v2123_v0  ;;  %v942_v1 = vpop.f32.mrb[45].mxu1 }
 0x25c   : > { %v943_v2 = vadd.f32 %v2123_v0, %v942_v1  ;;  %v1573_v4 = vpop.f32.mrb[46].mxu1  ;;  %1614 = vmatprep.mubr.bf16.mxu0 %v1001_v61 }
 0x25d   : > { %v954_v5 = vadd.f32 %v1573_v4, %v2123_v0  ;;  %v945_v6 = vpop.f32.mrb[47].mxu1  ;;  %1615 = vmatmul.mubr.bf16.gmra.mrb[40].mxu0 %v1002_v60  ;;  %v987_v8 = vmax.f32 %v951_v63, 0.0 }
 0x25e   : > { %v946_v7 = vadd.f32 %v2123_v0, %v945_v6  ;;  %v985_v10 = vmax.f32 %v943_v2, 0.0 }
 0x25f   : > { %v988_v9 = vmax.f32 %v954_v5, 0.0 }
 0x260   : > { %v986_v11 = vmax.f32 %v946_v7, 0.0 }
 0x261   : > { %v1004_v12 = vpack.c.bf16 %v988_v9, %v987_v8 }
 0x262   : > { %v1003_v13 = vpack.c.bf16 %v986_v11, %v985_v10 }
 0x264   : > { %1618 = vmatprep.mubr.bf16.mxu0 %v1003_v13 }
 0x265   : > { %1619 = vmatmul.mubr.bf16.gmra.mrb[44].mxu0 %v1004_v12 }
 0x300   : > { %v1592_v0 = vpop.f32.mrb[16].mxu0 }
 0x301   : > { %v1119_v15 = vadd.f32 %v1592_v0, %v2162_v14  ;;  %v1110_v16 = vpop.f32.mrb[17].mxu0 }
 0x302   : > { %v1111_v17 = vadd.f32 %v2162_v14, %v1110_v16  ;;  %v1593_v18 = vpop.f32.mrb[18].mxu0 }
 0x303   : > { %1240 = vst.msk [vmem:[%s2167_s22 + $0x10] sm:$0xff] %vm1237_vm0, %v1119_v15  ;;  %v1122_v19 = vadd.f32 %v1593_v18, %v2162_v14  ;;  %v1113_v20 = vpop.f32.mrb[19].mxu0 }
 0x304   : > { %1238 = vst.msk [vmem:[%s2167_s22] sm:$0xff] %vm1237_vm0, %v1111_v17  ;;  %v1114_v21 = vadd.f32 %v2162_v14, %v1113_v20 }
 0x305   : > { %1241 = vst.msk [vmem:[%s2167_s22 + $0x18] sm:$0xff] %vm1237_vm0, %v1122_v19 }
 0x306   : > { %1239 = vst.msk [vmem:[%s2167_s22 + $0x8] sm:$0xff] %vm1237_vm0, %v1114_v21 }
 0x308   : > { %v1596_v22 = vpop.f32.mrb[20].mxu0 }
 0x309   : > { %v1135_v23 = vadd.f32 %v1596_v22, %v2162_v14  ;;  %v1126_v24 = vpop.f32.mrb[21].mxu0 }
 0x30a   : > { %v1127_v25 = vadd.f32 %v2162_v14, %v1126_v24  ;;  %v1597_v38 = vpop.f32.mrb[22].mxu0 }
 0x30b   : > { %1244 = vst.msk [vmem:[%s2167_s22 + $0x30] sm:$0xff] %vm1237_vm0, %v1135_v23  ;;  %v1138_v3 = vadd.f32 %v1597_v38, %v2162_v14  ;;  %v1129_v26 = vpop.f32.mrb[23].mxu0 }
 0x30c   : > { %1242 = vst.msk [vmem:[%s2167_s22 + $0x20] sm:$0xff] %vm1237_vm0, %v1127_v25  ;;  %v1130_v27 = vadd.f32 %v2162_v14, %v1129_v26 }
 0x30d   : > { %1245 = vst.msk [vmem:[%s2167_s22 + $0x38] sm:$0xff] %vm1237_vm0, %v1138_v3 }
 0x30e   : > { %1243 = vst.msk [vmem:[%s2167_s22 + $0x28] sm:$0xff] %vm1237_vm0, %v1130_v27 }
 0x310   : > { %v1600_v28 = vpop.f32.mrb[24].mxu0 }
 0x311   : > { %v1151_v29 = vadd.f32 %v1600_v28, %v2162_v14  ;;  %v1142_v30 = vpop.f32.mrb[25].mxu0 }
 0x312   : > { %v1143_v31 = vadd.f32 %v2162_v14, %v1142_v30  ;;  %v1601_v32 = vpop.f32.mrb[26].mxu0 }
 0x313   : > { %1248 = vst.msk [vmem:[%s2167_s22 + $0x50] sm:$0xff] %vm1237_vm0, %v1151_v29  ;;  %v1154_v33 = vadd.f32 %v1601_v32, %v2162_v14  ;;  %v1145_v34 = vpop.f32.mrb[27].mxu0 }
 0x314   : > { %1246 = vst.msk [vmem:[%s2167_s22 + $0x40] sm:$0xff] %vm1237_vm0, %v1143_v31  ;;  %v1146_v35 = vadd.f32 %v2162_v14, %v1145_v34 }
 0x315   : > { %1249 = vst.msk [vmem:[%s2167_s22 + $0x58] sm:$0xff] %vm1237_vm0, %v1154_v33 }
 0x316   : > { %1247 = vst.msk [vmem:[%s2167_s22 + $0x48] sm:$0xff] %vm1237_vm0, %v1146_v35 }
 0x318   : > { %v1604_v36 = vpop.f32.mrb[28].mxu0 }
 0x319   : > { %v1167_v37 = vadd.f32 %v1604_v36, %v2162_v14  ;;  %v1158_v39 = vpop.f32.mrb[29].mxu0 }
 0x31a   : > { %v1159_v40 = vadd.f32 %v2162_v14, %v1158_v39  ;;  %v1605_v41 = vpop.f32.mrb[30].mxu0 }
 0x31b   : > { %1252 = vst.msk [vmem:[%s2167_s22 + $0x70] sm:$0xff] %vm1237_vm0, %v1167_v37  ;;  %v1170_v42 = vadd.f32 %v1605_v41, %v2162_v14  ;;  %v1161_v43 = vpop.f32.mrb[31].mxu0 }
 0x31c   : > { %1250 = vst.msk [vmem:[%s2167_s22 + $0x60] sm:$0xff] %vm1237_vm0, %v1159_v40  ;;  %v1162_v44 = vadd.f32 %v2162_v14, %v1161_v43 }
 0x31d   : > { %1253 = vst.msk [vmem:[%s2167_s22 + $0x78] sm:$0xff] %vm1237_vm0, %v1170_v42 }
 0x31e   : > { %1251 = vst.msk [vmem:[%s2167_s22 + $0x68] sm:$0xff] %vm1237_vm0, %v1162_v44 }
 0x320   : > { %v1608_v45 = vpop.f32.mrb[32].mxu0 }
 0x321   : > { %v1183_v46 = vadd.f32 %v1608_v45, %v2162_v14  ;;  %v1174_v47 = vpop.f32.mrb[33].mxu0 }
 0x322   : > { %v1175_v48 = vadd.f32 %v2162_v14, %v1174_v47  ;;  %v1609_v49 = vpop.f32.mrb[34].mxu0 }
 0x323   : > { %1256 = vst.msk [vmem:[%s2167_s22 + $0x90] sm:$0xff] %vm1237_vm0, %v1183_v46  ;;  %v1186_v50 = vadd.f32 %v1609_v49, %v2162_v14  ;;  %v1177_v51 = vpop.f32.mrb[35].mxu0 }
 0x324   : > { %1254 = vst.msk [vmem:[%s2167_s22 + $0x80] sm:$0xff] %vm1237_vm0, %v1175_v48  ;;  %v1178_v52 = vadd.f32 %v2162_v14, %v1177_v51 }
 0x325   : > { %1257 = vst.msk [vmem:[%s2167_s22 + $0x98] sm:$0xff] %vm1237_vm0, %v1186_v50 }
 0x326   : > { %1255 = vst.msk [vmem:[%s2167_s22 + $0x88] sm:$0xff] %vm1237_vm0, %v1178_v52 }
 0x328   : > { %v1612_v53 = vpop.f32.mrb[36].mxu0 }
 0x329   : > { %v1199_v54 = vadd.f32 %v1612_v53, %v2162_v14  ;;  %v1190_v55 = vpop.f32.mrb[37].mxu0 }
 0x32a   : > { %v1191_v56 = vadd.f32 %v2162_v14, %v1190_v55  ;;  %v1613_v57 = vpop.f32.mrb[38].mxu0 }
 0x32b   : > { %1260 = vst.msk [vmem:[%s2167_s22 + $0xb0] sm:$0xff] %vm1237_vm0, %v1199_v54  ;;  %v1202_v58 = vadd.f32 %v1613_v57, %v2162_v14  ;;  %v1193_v59 = vpop.f32.mrb[39].mxu0 }
 0x32c   : > { %1258 = vst.msk [vmem:[%s2167_s22 + $0xa0] sm:$0xff] %vm1237_vm0, %v1191_v56  ;;  %v1194_v60 = vadd.f32 %v2162_v14, %v1193_v59 }
 0x32d   : > { %1261 = vst.msk [vmem:[%s2167_s22 + $0xb8] sm:$0xff] %vm1237_vm0, %v1202_v58 }
 0x32e   : > { %1259 = vst.msk [vmem:[%s2167_s22 + $0xa8] sm:$0xff] %vm1237_vm0, %v1194_v60 }
 0x330   : > { %v1616_v61 = vpop.f32.mrb[40].mxu0 }
 0x331   : > { %v1215_v62 = vadd.f32 %v1616_v61, %v2162_v14  ;;  %v1206_v63 = vpop.f32.mrb[41].mxu0 }
 0x332   : > { %v1207_v1 = vadd.f32 %v2162_v14, %v1206_v63  ;;  %v1617_v2 = vpop.f32.mrb[42].mxu0 }
 0x333   : > { %1264 = vst.msk [vmem:[%s2167_s22 + $0xd0] sm:$0xff] %vm1237_vm0, %v1215_v62  ;;  %v1218_v4 = vadd.f32 %v1617_v2, %v2162_v14  ;;  %v1209_v5 = vpop.f32.mrb[43].mxu0 }
 0x334   : > { %1262 = vst.msk [vmem:[%s2167_s22 + $0xc0] sm:$0xff] %vm1237_vm0, %v1207_v1  ;;  %v1210_v6 = vadd.f32 %v2162_v14, %v1209_v5 }
 0x335   : > { %1265 = vst.msk [vmem:[%s2167_s22 + $0xd8] sm:$0xff] %vm1237_vm0, %v1218_v4 }
 0x336   : > { %1263 = vst.msk [vmem:[%s2167_s22 + $0xc8] sm:$0xff] %vm1237_vm0, %v1210_v6 }
 0x338   : > { %v1620_v7 = vpop.f32.mrb[44].mxu0 }
 0x339   : > { %v1231_v8 = vadd.f32 %v1620_v7, %v2162_v14  ;;  %v1222_v9 = vpop.f32.mrb[45].mxu0 }
 0x33a   : > { %v1223_v10 = vadd.f32 %v2162_v14, %v1222_v9  ;;  %v1621_v11 = vpop.f32.mrb[46].mxu0 }
 0x33b   : > { %1268 = vst.msk [vmem:[%s2167_s22 + $0xf0] sm:$0xff] %vm1237_vm0, %v1231_v8  ;;  %v1234_v12 = vadd.f32 %v1621_v11, %v2162_v14  ;;  %v1225_v13 = vpop.f32.mrb[47].mxu0 }
 0x33c   : > { %1266 = vst.msk [vmem:[%s2167_s22 + $0xe0] sm:$0xff] %vm1237_vm0, %v1223_v10  ;;  %v1226_v0 = vadd.f32 %v2162_v14, %v1225_v13 }
 0x33d   : > { %1269 = vst.msk [vmem:[%s2167_s22 + $0xf8] sm:$0xff] %vm1237_vm0, %v1234_v12 }
 0x33e   : > { %1267 = vst.msk [vmem:[%s2167_s22 + $0xe8] sm:$0xff] %vm1237_vm0, %v1226_v0 }
 0x33f PF: > { %p18_p6 = scmp.ge.s32.totalorder %s1919_s12, 4   ;;  %s2298_s24 = smov %s1818_s25 }
 0x340   : > { %s2299_s25 = smov %s1822_s26  ;;  %s2300_s26 = smov %s1948_s16 }
 0x341   : > { %s2301_s27 = smov %s1919_s12  ;;  %20 = sbr.rel (!%p18_p6) target bundleno = 4 (0x4), region = 92 }
 0x348   :  { %1292 = vsyncpa [#allocation3], 1 }
 0x349   :  { %1294 = vsyncpa [#allocation3 + $0x1], 1 }
 0x34a   :  { %1295 = vsyncpa [#allocation5], 1 }

</bundles_post_ra>
